<compile_context>
chip_gen: v7x
topology: tpu7x:2x2x1
jax: 0.10.0
libtpu: 0.0.40
codegen_flags: <defaults>
</compile_context>

<pallas_src>
import functools

import jax
import jax.numpy as jnp
from jax import lax
from jax.experimental import pallas as pl
from jax.experimental.pallas import tpu as pltpu

_LANES = 512                 # lane-dense last dim (multiple of 128)
_TARGET_BLOCK_ROWS = 1024    # ~2 MiB per f32 block -> safe in VMEM on all gens


def _to_i32(x: int) -> int:
    """Wrap a python int into the signed int32 range (two's complement)."""
    x &= 0xFFFFFFFF
    return x - (1 << 32) if x >= (1 << 31) else x


_GOLDEN = _to_i32(0x9E3779B1)
_MIX1 = _to_i32(0x7FEB352D)
_MIX2 = _to_i32(0x846CA68B)


def _srl(v, k: int):
    """Logical right shift of an int32 array by a static amount k."""
    return (v >> k) & jnp.int32((1 << (32 - k)) - 1)


def _hash32(v):
    """lowbias32-style integer mixer: counter -> uniform 32-bit value."""
    v = v ^ _srl(v, 16)
    v = v * jnp.int32(_MIX1)
    v = v ^ _srl(v, 15)
    v = v * jnp.int32(_MIX2)
    v = v ^ _srl(v, 16)
    return v


def _bayes_dropout_kernel(seed_ref, x_ref, o_ref, *, thr_s, scale,
                          block_rows, lanes):
    # Global (tiling-invariant) linear element index of every lane in the tile.
    shape = x_ref.shape
    row0 = pl.program_id(0) * block_rows
    r = lax.broadcasted_iota(jnp.int32, shape, 0)
    c = lax.broadcasted_iota(jnp.int32, shape, 1)
    gid = (row0 + r) * lanes + c                      # int32; wrap is harmless

    # Counter-based PRNG: hash(global_index ^ f(seed)) ~ uniform 32-bit.
    seed = seed_ref[0]
    h = _hash32(gid ^ (seed * jnp.int32(_GOLDEN)))

    # keep  <=>  uniform_u32 >= p * 2^32, expressed as a signed int32 compare.
    keep = h >= jnp.int32(thr_s)

    xv = x_ref[...]
    o_ref[...] = jnp.where(keep, xv.astype(jnp.float32) * scale,
                           0.0).astype(o_ref.dtype)


def bayes_dropout(x, *, p=0.5, seed=0, training=True):
    """Pallas TPU implementation of BayesDropout.forward (dtype preserving)."""
    assert 0.0 <= p <= 1.0, "p must be in [0, 1]"
    if not training or p == 0.0:
        return x
    assert p < 1.0, "p must be smaller than 1 so that 1/(1-p) is finite"

    scale = 1.0 / (1.0 - p)
    # Drop iff hash_u32 < round(p * 2^32); map to a signed threshold.
    thr_u = min(int(round(p * 4294967296.0)), 4294967295)
    thr_s = thr_u - 2147483648                        # in [-2^31, 2^31 - 1]

    orig_shape = x.shape
    dtype = x.dtype
    total = int(x.size)

    # Lane-dense 2-D view: last dim = 512 (multiple of 128) for any NCHW shape.
    rows = -(-total // _LANES)
    if rows <= _TARGET_BLOCK_ROWS:
        block_rows = rows                             # single block == full dim
        padded_rows = rows
    else:
        block_rows = _TARGET_BLOCK_ROWS               # multiple of 8
        padded_rows = -(-rows // block_rows) * block_rows
    padded_total = padded_rows * _LANES

    xf = x.reshape(-1)
    if padded_total != total:
        xf = jnp.pad(xf, (0, padded_total - total))
    x2d = xf.reshape(padded_rows, _LANES)

    seed_arr = jnp.asarray([seed], dtype=jnp.int32)

    kernel = functools.partial(
        _bayes_dropout_kernel,
        thr_s=thr_s, scale=float(scale),
        block_rows=block_rows, lanes=_LANES,
    )

    itemsize = jnp.dtype(dtype).itemsize
    out2d = pl.pallas_call(
        kernel,
        out_shape=jax.ShapeDtypeStruct((padded_rows, _LANES), dtype),
        grid_spec=pltpu.PrefetchScalarGridSpec(
            num_scalar_prefetch=1,                    # seed lands in SMEM
            grid=(padded_rows // block_rows,),
            in_specs=[pl.BlockSpec((block_rows, _LANES),
                                   lambda i, seed: (i, 0))],
            out_specs=pl.BlockSpec((block_rows, _LANES),
                                   lambda i, seed: (i, 0)),
        ),
        compiler_params=pltpu.CompilerParams(
            dimension_semantics=("parallel",),        # both v7x TCs can help
        ),
        cost_estimate=pl.CostEstimate(
            flops=3 * padded_total,
            transcendentals=0,
            bytes_accessed=2 * padded_total * itemsize,
        ),
    )(seed_arr, x2d)

    out = out2d.reshape(-1)
    if padded_total != total:
        out = out[:total]
    return out.reshape(orig_shape)


if __name__ == "__main__":
    key = jax.random.PRNGKey(0)
    # NCHW input, consistent with typical conv-net usage of this module.
    x = jax.random.normal(key, (2, 4, 16, 16), dtype=jnp.float32)

    p = 0.5
    out = jax.block_until_ready(bayes_dropout(x, p=p, seed=0, training=True))

    # Shape / dtype preserved; kept entries scaled by 1/(1-p); dropped are 0.
    assert out.shape == x.shape and out.dtype == x.dtype
    scale = 1.0 / (1.0 - p)
    mask = out != 0.0
    assert jnp.allclose(jnp.where(mask, out, 0.0),
                        jnp.where(mask, x * scale, 0.0), atol=1e-5)
    drop_frac = 1.0 - float(jnp.mean(mask.astype(jnp.float32)))
    assert 0.3 < drop_frac < 0.7                      # ~p on 2048 elements

    # Odd, non-128-aligned NCHW shape exercises the padding path.
    x_odd = jax.random.normal(jax.random.PRNGKey(1), (3, 5, 7, 9), jnp.float32)
    out_odd = jax.block_until_ready(bayes_dropout(x_odd, p=0.3, seed=7))
    assert out_odd.shape == x_odd.shape
    m = out_odd != 0.0
    assert jnp.allclose(jnp.where(m, out_odd, 0.0),
                        jnp.where(m, x_odd / 0.7, 0.0), atol=1e-5)

    # Eval-mode path: identity.
    out_eval = jax.block_until_ready(bayes_dropout(x, p=p, training=False))
    assert jnp.array_equal(out_eval, x)

    print("KERNEL_OK")
</pallas_src>

<mosaic_0001>
module attributes {stable_mosaic.version = 11 : i64} {
  func.func @_bayes_dropout_kernel(%arg0: i32, %arg1: memref<1xi32, #tpu.memory_space<smem>>, %arg2: memref<4x512xf32, #tpu.memory_space<vmem>>, %arg3: memref<4x512xf32, #tpu.memory_space<vmem>>) attributes {dimension_semantics = [#tpu.dimension_semantics<parallel>], iteration_bounds = array<i64: 1>, scalar_prefetch = 1 : i64, scratch_operands = 0 : i64, tpu.core_type = #tpu.core_type<tc>, window_params = [{transform_indices = @transform_0, window_bounds = array<i64: 4, 512>}, {transform_indices = @transform_1, window_bounds = array<i64: 4, 512>}]} {
    %c4_i32 = arith.constant 4 : i32
    %0 = arith.muli %arg0, %c4_i32 : i32
    %1 = tpu.iota {dimensions = array<i32: 0>} : vector<4x512xi32>
    %2 = tpu.iota {dimensions = array<i32: 1>} : vector<4x512xi32>
    %3 = vector.broadcast %0 : i32 to vector<4x512xi32>
    %4 = arith.addi %3, %1 : vector<4x512xi32>
    %c512_i32 = arith.constant 512 : i32
    %5 = vector.broadcast %c512_i32 : i32 to vector<4x512xi32>
    %6 = arith.muli %4, %5 : vector<4x512xi32>
    %7 = arith.addi %6, %2 : vector<4x512xi32>
    %c0 = arith.constant 0 : index
    %8 = memref.load %arg1[%c0] : memref<1xi32, #tpu.memory_space<smem>>
    %c-1640531535_i32 = arith.constant -1640531535 : i32
    %9 = arith.muli %8, %c-1640531535_i32 : i32
    %10 = vector.broadcast %9 : i32 to vector<4x512xi32>
    %11 = arith.xori %7, %10 : vector<4x512xi32>
    %c16_i32 = arith.constant 16 : i32
    %12 = vector.broadcast %c16_i32 : i32 to vector<4x512xi32>
    %13 = arith.shrsi %11, %12 : vector<4x512xi32>
    %c65535_i32 = arith.constant 65535 : i32
    %14 = vector.broadcast %c65535_i32 : i32 to vector<4x512xi32>
    %15 = arith.andi %13, %14 : vector<4x512xi32>
    %16 = arith.xori %11, %15 : vector<4x512xi32>
    %c2146121005_i32 = arith.constant 2146121005 : i32
    %17 = vector.broadcast %c2146121005_i32 : i32 to vector<4x512xi32>
    %18 = arith.muli %16, %17 : vector<4x512xi32>
    %c15_i32 = arith.constant 15 : i32
    %19 = vector.broadcast %c15_i32 : i32 to vector<4x512xi32>
    %20 = arith.shrsi %18, %19 : vector<4x512xi32>
    %c131071_i32 = arith.constant 131071 : i32
    %21 = vector.broadcast %c131071_i32 : i32 to vector<4x512xi32>
    %22 = arith.andi %20, %21 : vector<4x512xi32>
    %23 = arith.xori %18, %22 : vector<4x512xi32>
    %c-2073254261_i32 = arith.constant -2073254261 : i32
    %24 = vector.broadcast %c-2073254261_i32 : i32 to vector<4x512xi32>
    %25 = arith.muli %23, %24 : vector<4x512xi32>
    %c16_i32_0 = arith.constant 16 : i32
    %26 = vector.broadcast %c16_i32_0 : i32 to vector<4x512xi32>
    %27 = arith.shrsi %25, %26 : vector<4x512xi32>
    %c65535_i32_1 = arith.constant 65535 : i32
    %28 = vector.broadcast %c65535_i32_1 : i32 to vector<4x512xi32>
    %29 = arith.andi %27, %28 : vector<4x512xi32>
    %30 = arith.xori %25, %29 : vector<4x512xi32>
    %c0_i32 = arith.constant 0 : i32
    %31 = vector.broadcast %c0_i32 : i32 to vector<4x512xi32>
    %32 = arith.cmpi sge, %30, %31 : vector<4x512xi32>
    %c0_2 = arith.constant 0 : index
    %c0_3 = arith.constant 0 : index
    %33 = vector.load %arg2[%c0_2, %c0_3] : memref<4x512xf32, #tpu.memory_space<vmem>>, vector<4x512xf32>
    %cst = arith.constant 2.000000e+00 : f32
    %34 = vector.broadcast %cst : f32 to vector<4x512xf32>
    %35 = arith.mulf %33, %34 : vector<4x512xf32>
    %cst_4 = arith.constant 0.000000e+00 : f32
    %36 = vector.broadcast %cst_4 : f32 to vector<4x512xf32>
    %37 = arith.select %32, %35, %36 : vector<4x512xi1>, vector<4x512xf32>
    %c0_5 = arith.constant 0 : index
    %c0_6 = arith.constant 0 : index
    %38 = vector.load %arg3[%c0_5, %c0_6] : memref<4x512xf32, #tpu.memory_space<vmem>>, vector<4x512xf32>
    tpu.vector_store %arg3[%c0_5, %c0_6], %37 {strides = array<i32>} : memref<4x512xf32, #tpu.memory_space<vmem>>, vector<4x512xf32>,
    return
  }
  func.func @transform_0(%arg0: i32, %arg1: memref<1xi32, #tpu.memory_space<smem>>) -> (i32, i32) {
    %c0_i32 = arith.constant 0 : i32
    %c0_i32_0 = arith.constant 0 : i32
    return %arg0, %c0_i32 : i32, i32
  }
  func.func @transform_1(%arg0: i32, %arg1: memref<1xi32, #tpu.memory_space<smem>>) -> (i32, i32) {
    %c0_i32 = arith.constant 0 : i32
    %c0_i32_0 = arith.constant 0 : i32
    return %arg0, %c0_i32 : i32, i32
  }
}

</mosaic_0001>

<bundles_post_ra>
// kernel: tpu_custom_call.1
= control target key start
LH: loop header
LB: loop body
LE: loop exit
PB: predicated region body
PF: predicated region fallthrough
CT: control target
= control target key end

     0   :  { %8 = vsyncpa [#allocation5], 0  ;;  %s238_s0 = inlined_call_operand.<no memory space> [shape: s32[1], index: 0, kind: input, shape index: {}]   ;;  %s239_s1 = inlined_call_operand.hbm [shape: f32[4,512], index: 1, kind: input, shape index: {}]   ;;  %s240_s2 = inlined_call_operand.hbm [shape: f32[4,512], index: 2, kind: output, shape index: {}]  }
   0x1   :  { %9 = vsyncpa [#allocation6], 0  ;;  %s194_s9 = smov [#allocation4]   ;;  %s146_s13 = scalar_lea.hbm %s239_s1, 256 }
   0x2   :  { %s16_s10 = sshll.u32 %s194_s9, 4  ;;  %p147_p0 = scmp.ne.s32.totalorder %s239_s1, %s146_s13  ;;  %s17_s10 = int_to_ptr.vmem [resolvable:$true] %s16_s10 }
   0x3   :  { %p150_p1 = scmp.lt.u32.totalorder %s146_s13, %s239_s1 }
   0x5   :  { %p152_p2 = pnand %p150_p1, %p147_p0 }
   0x7   :  { %155 = shalt.err (!%p152_p2)
}
   0x8   :  { %s156_s18 = scalar_lea.vmem %s17_s10, 256  ;;  %p161_p4 = scmp.lt.s32.totalorder %s17_s10, %s17_s10 }
   0x9   :  { %p157_p3 = scmp.ne.s32.totalorder %s17_s10, %s156_s18  ;;  %p162_p5 = scmp.lt.s32.totalorder %s156_s18, %s156_s18 }
   0xb   :  { %p163_p6 = por %p162_p5, %p161_p4 }
   0xd   :  { %p164_p7 = pnand %p163_p6, %p157_p3 }
   0xf   :  { %167 = shalt.err (!%p164_p7)
}
  0x10   :  { %19 = dma.hbm_to_vmem [thread:$0]  %s239_s1, 256, %s17_s10, [#allocation5]  }
  0x11   :  { %190 = dma.done.wait [#allocation5], 256  }
  0x12   :  { %191 = vsyncadd [#allocation5], 4294967040  ;;  %v24_v0 = vlaneseq  ;;  %s39_s23 = smul.u32 2654435761, %s238_s0  ;;  %v93_v30 = vld [vmem:[#allocation4] sm:$0xff]  ;;  %v94_v33 = vld [vmem:[#allocation4 + $0x8] sm:$0xff] }
  0x13   :  { %v95_v36 = vmul.f32 2.0, %v93_v30  ;;  %v96_v41 = vmul.f32 2.0, %v94_v33  ;;  %s195_s0 = smov [#allocation7]  }
  0x14   :  { %v25_v1 = vshrl.u32 %v24_v0, 7  ;;  %v27_v2 = vand.u32 127, %v24_v0  ;;  %v40_v7 = vstv %s39_s23  ;;  %s123_s1 = sshll.u32 %s195_s0, 4  ;;  %s124_s1 = int_to_ptr.vmem [resolvable:$true] %s123_s1 }
  0x15   :  { %v99_v46 = vcombine.high %v95_v36, %v95_v36  ;;  %v100_v51 = vcombine.high %v96_v41, %v96_v41  ;;  %s168_s24 = scalar_lea.vmem %s124_s1, 256  ;;  %p173_p9 = scmp.lt.s32.totalorder %s124_s1, %s124_s1 }
  0x16   :  { %v28_v3 = vadd.s32 128, %v27_v2  ;;  %v33_v4 = vmul.u32 512, %v25_v1  ;;  %v29_v5 = vadd.s32 256, %v27_v2  ;;  %v30_v6 = vadd.s32 384, %v27_v2  ;;  %p169_p8 = scmp.ne.s32.totalorder %s124_s1, %s168_s24  ;;  %p174_p10 = scmp.lt.s32.totalorder %s168_s24, %s168_s24 }
  0x18   :  { %v34_v8 = vadd.s32 %v33_v4, %v27_v2  ;;  %v35_v9 = vadd.s32 %v33_v4, %v28_v3  ;;  %v36_v10 = vadd.s32 %v33_v4, %v29_v5  ;;  %v37_v11 = vadd.s32 %v33_v4, %v30_v6  ;;  %p175_p11 = por %p174_p10, %p173_p9 }
  0x1a   :  { %v41_v12 = vxor.u32 %v40_v7, %v34_v8  ;;  %v42_v13 = vxor.u32 %v40_v7, %v35_v9  ;;  %v43_v14 = vxor.u32 %v40_v7, %v36_v10  ;;  %v44_v15 = vxor.u32 %v40_v7, %v37_v11  ;;  %p176_p12 = pnand %p175_p11, %p169_p8 }
  0x1c   :  { %v132_v16 = vshrl.u32 %v41_v12, 16  ;;  %v133_v17 = vshrl.u32 %v42_v13, 16  ;;  %v134_v18 = vshrl.u32 %v43_v14, 16  ;;  %v135_v19 = vshrl.u32 %v44_v15, 16 }
  0x1e   :  { %v53_v20 = vxor.u32 %v132_v16, %v41_v12  ;;  %v54_v21 = vxor.u32 %v133_v17, %v42_v13  ;;  %v55_v22 = vxor.u32 %v134_v18, %v43_v14  ;;  %v56_v23 = vxor.u32 %v135_v19, %v44_v15 }
  0x20   :  { %v57_v24 = vmul.u32 2146121005, %v53_v20  ;;  %v58_v25 = vmul.u32 2146121005, %v54_v21 }
  0x21   :  { %v59_v26 = vmul.u32 2146121005, %v55_v22  ;;  %v60_v27 = vmul.u32 2146121005, %v56_v23 }
  0x22   :  { %v136_v28 = vshrl.u32 %v57_v24, 15  ;;  %v137_v29 = vshrl.u32 %v58_v25, 15 }
  0x23   :  { %v138_v31 = vshrl.u32 %v59_v26, 15  ;;  %v139_v32 = vshrl.u32 %v60_v27, 15 }
  0x24   :  { %v69_v34 = vxor.u32 %v136_v28, %v57_v24  ;;  %v70_v35 = vxor.u32 %v137_v29, %v58_v25 }
  0x25   :  { %v71_v37 = vxor.u32 %v138_v31, %v59_v26  ;;  %v72_v38 = vxor.u32 %v139_v32, %v60_v27 }
  0x26   :  { %v73_v39 = vmul.u32 2221713035, %v69_v34  ;;  %v74_v40 = vmul.u32 2221713035, %v70_v35 }
  0x27   :  { %v75_v42 = vmul.u32 2221713035, %v71_v37  ;;  %v76_v43 = vmul.u32 2221713035, %v72_v38 }
  0x28   :  { %v140_v44 = vshrl.u32 %v73_v39, 16  ;;  %v141_v45 = vshrl.u32 %v74_v40, 16 }
  0x29   :  { %v142_v47 = vshrl.u32 %v75_v42, 16  ;;  %v143_v48 = vshrl.u32 %v76_v43, 16 }
  0x2a   :  { %v85_v49 = vxor.u32 %v140_v44, %v73_v39  ;;  %v86_v50 = vxor.u32 %v141_v45, %v74_v40 }
  0x2b   :  { %v87_v52 = vxor.u32 %v142_v47, %v75_v42  ;;  %v88_v53 = vxor.u32 %v143_v48, %v76_v43 }
  0x2c   :  { %vm89_vm0 = vcmp.ge.s32.totalorder %v85_v49, 0  ;;  %vm90_vm1 = vcmp.ge.s32.totalorder %v86_v50, 0 }
  0x2d   :  { %v103_v54 = vsel %vm89_vm0, %v95_v36, 0.0  ;;  %v104_v55 = vsel %vm90_vm1, %v99_v46, 0.0  ;;  %vm91_vm2 = vcmp.ge.s32.totalorder %v87_v52, 0  ;;  %vm92_vm3 = vcmp.ge.s32.totalorder %v88_v53, 0 }
  0x2e   :  { %v111_v56 = vcombine.low %v103_v54, %v104_v55  ;;  %v105_v57 = vsel %vm91_vm2, %v96_v41, 0.0  ;;  %v106_v58 = vsel %vm92_vm3, %v100_v51, 0.0 }
  0x2f   :  { %v112_v59 = vcombine.low %v105_v57, %v106_v58 }
  0x30   :  { %115 = vst [vmem:[#allocation7] sm:$0xff] %v111_v56 }
  0x31   :  { %116 = vst [vmem:[#allocation7 + $0x8] sm:$0xff] %v112_v59 }
  0x32   :  { %179 = shalt.err (!%p176_p12)
}
  0x33   :  { %s180_s27 = scalar_lea.hbm %s240_s2, 256 }
  0x34   :  { %p181_p13 = scmp.ne.s32.totalorder %s240_s2, %s180_s27  ;;  %p184_p0 = scmp.lt.u32.totalorder %s180_s27, %s240_s2 }
  0x36   :  { %p186_p1 = pnand %p184_p0, %p181_p13 }
  0x38   :  { %189 = shalt.err (!%p186_p1)
}
  0x39   :  { %126 = dma.vmem_to_hbm [thread:$0]  %s124_s1, 256, %s240_s2, [#allocation6]  }
  0x3a   :  { %192 = dma.done.wait [#allocation6], 256  }
  0x3b   :  { %193 = vsyncadd [#allocation6], 4294967040 }
  0x3c   :  { %130 = vsyncpa [#allocation5], 1 }
  0x3d   :  { %131 = vsyncpa [#allocation6], 1 }

</bundles_post_ra>
